<compile_context>
chip_gen: v5e
topology: v5e:2x2
jax: 0.10.0
libtpu: 0.0.40
codegen_flags: <defaults>
</compile_context>

<pallas_src>
import functools

import jax
import jax.numpy as jnp
from jax.experimental import pallas as pl
from jax.experimental.pallas import tpu as pltpu

HIDDEN_LAYER_SIZE = 30

# Batches up to this many rows run as a single grid step (v5e/v6e sweet spot).
_SINGLE_STEP_MAX = 1024
# Cap on rows per grid step when tiling very large batches.
_MAX_BATCH_TILE = 1024


def _round_up(x, m):
    return ((x + m - 1) // m) * m


def _mlp_kernel(x_ref, w1_ref, b1_ref, w2_ref, b2_ref, w3_ref, b3_ref, out_ref):
    cdt = w1_ref.dtype  # compute (MXU operand) dtype, e.g. bf16; accumulate in f32
    x = x_ref[...].astype(cdt)
    # fc1 + ReLU
    h1 = jnp.dot(x, w1_ref[...], preferred_element_type=jnp.float32) + b1_ref[...]
    h1 = jnp.maximum(h1, 0.0)
    # fc2 + ReLU
    h2 = jnp.dot(h1.astype(cdt), w2_ref[...],
                 preferred_element_type=jnp.float32) + b2_ref[...]
    h2 = jnp.maximum(h2, 0.0)
    # fc3 (q_values, no activation)
    q = jnp.dot(h2.astype(cdt), w3_ref[...],
                preferred_element_type=jnp.float32) + b3_ref[...]
    out_ref[...] = q.astype(out_ref.dtype)


def prepare_padded_params(params, weight_dtype=jnp.bfloat16):
    """Pad weights/biases to TPU-friendly tiles ONCE (reused every forward).

    Only the lane (feature-output) dims are padded to a multiple of 128; the
    input_size contraction dim of w1 is left untouched (full-dim block).
    Weights are cast to `weight_dtype` (bf16 by default: native MXU path,
    half the DMA/VMEM); biases stay f32.  Zero padding is semantics-preserving:
    padded bias entries are 0 and ReLU(0)=0, so padded hidden columns stay
    exactly zero through the net.
    """
    in_dim, H = params["w1"].shape
    A = params["w3"].shape[1]
    Hp = _round_up(H, 128)
    Ap = _round_up(A, 128)

    def padw(w, r, c):
        w = jnp.pad(w.astype(jnp.float32), ((0, r - w.shape[0]), (0, c - w.shape[1])))
        return w.astype(weight_dtype)

    def padb(b, c):
        return jnp.pad(b.astype(jnp.float32), (0, c - b.shape[0]))[None, :]

    return {
        "w1": padw(params["w1"], in_dim, Hp), "b1": padb(params["b1"], Hp),
        "w2": padw(params["w2"], Hp, Hp),     "b2": padb(params["b2"], Hp),
        "w3": padw(params["w3"], Hp, Ap),     "b3": padb(params["b3"], Ap),
    }


@functools.partial(jax.jit, static_argnames=("nb_action",))
def network_forward(state, padded, nb_action):
    """Forward pass of the 3-layer Q-network.

    state:  [B, input_size] float32
    padded: pytree from prepare_padded_params
    returns q_values: [B, nb_action] float32
    """
    B, in_dim = state.shape
    Ap = padded["w3"].shape[1]

    # Tile selection (traces once per distinct batch shape -- acting vs training):
    #  * B <= 1024: one grid step over the exact batch (no partial blocks at all).
    #  * B  > 1024: an EVEN number of 8-aligned tiles <= 1024 rows each, so the
    #    "parallel" batch axis splits evenly across v7x's two TensorCores.
    if B <= _SINGLE_STEP_MAX:
        tb = B
    else:
        n_tiles = 2 * pl.cdiv(B, 2 * _MAX_BATCH_TILE)
        tb = _round_up(pl.cdiv(B, n_tiles), 8)
    grid = (pl.cdiv(B, tb),)

    const = lambda i: (0, 0)  # weights/biases: same block every step (VMEM-resident)

    q = pl.pallas_call(
        _mlp_kernel,
        out_shape=jax.ShapeDtypeStruct((B, Ap), jnp.bfloat16),
        grid=grid,
        in_specs=[
            pl.BlockSpec((tb, in_dim), lambda i: (i, 0)),     # x: tiled over batch
            pl.BlockSpec(padded["w1"].shape, const),          # w1
            pl.BlockSpec(padded["b1"].shape, const),          # b1
            pl.BlockSpec(padded["w2"].shape, const),          # w2
            pl.BlockSpec(padded["b2"].shape, const),          # b2
            pl.BlockSpec(padded["w3"].shape, const),          # w3
            pl.BlockSpec(padded["b3"].shape, const),          # b3
        ],
        out_specs=pl.BlockSpec((tb, Ap), lambda i: (i, 0)),
        compiler_params=pltpu.CompilerParams(
            dimension_semantics=("parallel",),
        ),
    )(state.astype(jnp.float32), padded["w1"], padded["b1"], padded["w2"],
      padded["b2"], padded["w3"], padded["b3"])

    return q[:, :nb_action].astype(jnp.float32)


def init_params(key, input_size, nb_action):
    """Deterministic init mimicking nn.Linear default (uniform +-1/sqrt(fan_in)).

    Weights are stored as [in, out] (transpose of PyTorch's [out, in])."""
    H = HIDDEN_LAYER_SIZE
    k1, k2, k3, k4, k5, k6 = jax.random.split(key, 6)

    def lin_init(kw, kb, fan_in, fan_out):
        bound = 1.0 / jnp.sqrt(jnp.float32(fan_in))
        w = jax.random.uniform(kw, (fan_in, fan_out), jnp.float32, -bound, bound)
        b = jax.random.uniform(kb, (fan_out,), jnp.float32, -bound, bound)
        return w, b

    w1, b1 = lin_init(k1, k2, input_size, H)
    w2, b2 = lin_init(k3, k4, H, H)
    w3, b3 = lin_init(k5, k6, H, nb_action)
    return {"w1": w1, "b1": b1, "w2": w2, "b2": b2, "w3": w3, "b3": b3}


def _reference_f32(state, params):
    """Pure f32 reference (matches the PyTorch module numerics)."""
    h1 = jnp.maximum(state @ params["w1"] + params["b1"], 0.0)
    h2 = jnp.maximum(h1 @ params["w2"] + params["b2"], 0.0)
    return h2 @ params["w3"] + params["b3"]


def _reference_matched(state, padded, nb_action):
    """Reference applying the same numerical recipe as the kernel
    (bf16 operands, f32 accumulation, bf16 output tile)."""
    cdt = padded["w1"].dtype
    x = state.astype(jnp.float32).astype(cdt)
    h1 = jnp.maximum(
        jnp.dot(x, padded["w1"], preferred_element_type=jnp.float32) + padded["b1"], 0.0)
    h2 = jnp.maximum(
        jnp.dot(h1.astype(cdt), padded["w2"],
                preferred_element_type=jnp.float32) + padded["b2"], 0.0)
    q = jnp.dot(h2.astype(cdt), padded["w3"],
                preferred_element_type=jnp.float32) + padded["b3"]
    return q.astype(jnp.bfloat16)[:, :nb_action].astype(jnp.float32)


def _check(state, params, padded, nb_action):
    q = jax.block_until_ready(network_forward(state, padded, nb_action))
    assert q.shape == (state.shape[0], nb_action)
    # Tight check against a reference using the exact same bf16/f32 recipe.
    q_matched = _reference_matched(state, padded, nb_action)
    assert jnp.allclose(q, q_matched, atol=2e-2, rtol=2e-2), "mismatch vs matched ref"
    # Loose sanity check against the pure-f32 PyTorch-equivalent reference
    # (difference is only bf16 rounding of weights/activations).
    q_f32 = _reference_f32(state, params)
    assert jnp.allclose(q, q_f32, atol=1e-1, rtol=1e-1), "mismatch vs f32 ref"
    return q


if __name__ == "__main__":
    key = jax.random.PRNGKey(0)
    k_params, k_s, k_b, k_h = jax.random.split(key, 4)

    # Self-driving-car DQN: 5 input signals, 3 actions.
    input_size, nb_action = 5, 3

    params = init_params(k_params, input_size, nb_action)
    padded = prepare_padded_params(params)  # pad + cast weights once, reuse every step

    # Small (acting) batch: single grid step, no padding/partial blocks at all.
    state = jax.random.normal(k_s, (2, input_size), jnp.float32)
    _check(state, params, padded, nb_action)

    # Replay-buffer-sized batch: still one grid step (<= 1024 rows).
    big_state = jax.random.normal(k_b, (512, input_size), jnp.float32)
    _check(big_state, params, padded, nb_action)

    # Very large batch: even grid (4 tiles of 656 rows), exercises the parallel
    # batch axis (v7x megacore) and the masked partial last block.
    huge_state = jax.random.normal(k_h, (2600, input_size), jnp.float32)
    _check(huge_state, params, padded, nb_action)

    print("KERNEL_OK")
</pallas_src>

<mosaic_0001>
module attributes {stable_mosaic.version = 11 : i64} {
  func.func @_mlp_kernel(%arg0: i32, %arg1: memref<2x5xf32, #tpu.memory_space<vmem>>, %arg2: memref<5x128xbf16, #tpu.memory_space<vmem>>, %arg3: memref<1x128xf32, #tpu.memory_space<vmem>>, %arg4: memref<128x128xbf16, #tpu.memory_space<vmem>>, %arg5: memref<1x128xf32, #tpu.memory_space<vmem>>, %arg6: memref<128x128xbf16, #tpu.memory_space<vmem>>, %arg7: memref<1x128xf32, #tpu.memory_space<vmem>>, %arg8: memref<2x128xbf16, #tpu.memory_space<vmem>>) attributes {dimension_semantics = [#tpu.dimension_semantics<parallel>], iteration_bounds = array<i64: 1>, scalar_prefetch = 0 : i64, scratch_operands = 0 : i64, tpu.core_type = #tpu.core_type<tc>, window_params = [{transform_indices = @transform_0, window_bounds = array<i64: 2, 5>}, {pipeline_mode = #tpu.pipeline_mode<synchronous>, transform_indices = @transform_1, window_bounds = array<i64: 5, 128>}, {pipeline_mode = #tpu.pipeline_mode<synchronous>, transform_indices = @transform_2, window_bounds = array<i64: 1, 128>}, {pipeline_mode = #tpu.pipeline_mode<synchronous>, transform_indices = @transform_3, window_bounds = array<i64: 128, 128>}, {pipeline_mode = #tpu.pipeline_mode<synchronous>, transform_indices = @transform_4, window_bounds = array<i64: 1, 128>}, {pipeline_mode = #tpu.pipeline_mode<synchronous>, transform_indices = @transform_5, window_bounds = array<i64: 128, 128>}, {pipeline_mode = #tpu.pipeline_mode<synchronous>, transform_indices = @transform_6, window_bounds = array<i64: 1, 128>}, {transform_indices = @transform_7, window_bounds = array<i64: 2, 128>}]} {
    %c0 = arith.constant 0 : index
    %c0_0 = arith.constant 0 : index
    %0 = vector.load %arg1[%c0, %c0_0] : memref<2x5xf32, #tpu.memory_space<vmem>>, vector<2x5xf32>
    %1 = arith.truncf %0 : vector<2x5xf32> to vector<2x5xbf16>
    %c0_1 = arith.constant 0 : index
    %c0_2 = arith.constant 0 : index
    %2 = vector.load %arg2[%c0_1, %c0_2] : memref<5x128xbf16, #tpu.memory_space<vmem>>, vector<5x128xbf16>
    %cst = arith.constant dense<0.000000e+00> : vector<2x128xf32>
    %3 = tpu.matmul %1, %2, %cst {dimension_numbers = #tpu.dot_dimension_numbers<[1], [0], [0], [1], [0, 0, 1, 1], [], []>} : vector<2x5xbf16>, vector<5x128xbf16>, vector<2x128xf32> -> vector<2x128xf32>
    %c0_3 = arith.constant 0 : index
    %c0_4 = arith.constant 0 : index
    %4 = vector.load %arg3[%c0_3, %c0_4] : memref<1x128xf32, #tpu.memory_space<vmem>>, vector<1x128xf32>
    %5 = vector.broadcast %4 : vector<1x128xf32> to vector<2x128xf32>
    %6 = arith.addf %3, %5 : vector<2x128xf32>
    %cst_5 = arith.constant 0.000000e+00 : f32
    %7 = vector.broadcast %cst_5 : f32 to vector<2x128xf32>
    %8 = arith.maximumf %6, %7 : vector<2x128xf32>
    %9 = arith.truncf %8 : vector<2x128xf32> to vector<2x128xbf16>
    %c0_6 = arith.constant 0 : index
    %c0_7 = arith.constant 0 : index
    %10 = vector.load %arg4[%c0_6, %c0_7] : memref<128x128xbf16, #tpu.memory_space<vmem>>, vector<128x128xbf16>
    %cst_8 = arith.constant dense<0.000000e+00> : vector<2x128xf32>
    %11 = tpu.matmul %9, %10, %cst_8 {dimension_numbers = #tpu.dot_dimension_numbers<[1], [0], [0], [1], [0, 0, 1, 1], [], []>} : vector<2x128xbf16>, vector<128x128xbf16>, vector<2x128xf32> -> vector<2x128xf32>
    %c0_9 = arith.constant 0 : index
    %c0_10 = arith.constant 0 : index
    %12 = vector.load %arg5[%c0_9, %c0_10] : memref<1x128xf32, #tpu.memory_space<vmem>>, vector<1x128xf32>
    %13 = vector.broadcast %12 : vector<1x128xf32> to vector<2x128xf32>
    %14 = arith.addf %11, %13 : vector<2x128xf32>
    %cst_11 = arith.constant 0.000000e+00 : f32
    %15 = vector.broadcast %cst_11 : f32 to vector<2x128xf32>
    %16 = arith.maximumf %14, %15 : vector<2x128xf32>
    %17 = arith.truncf %16 : vector<2x128xf32> to vector<2x128xbf16>
    %c0_12 = arith.constant 0 : index
    %c0_13 = arith.constant 0 : index
    %18 = vector.load %arg6[%c0_12, %c0_13] : memref<128x128xbf16, #tpu.memory_space<vmem>>, vector<128x128xbf16>
    %cst_14 = arith.constant dense<0.000000e+00> : vector<2x128xf32>
    %19 = tpu.matmul %17, %18, %cst_14 {dimension_numbers = #tpu.dot_dimension_numbers<[1], [0], [0], [1], [0, 0, 1, 1], [], []>} : vector<2x128xbf16>, vector<128x128xbf16>, vector<2x128xf32> -> vector<2x128xf32>
    %c0_15 = arith.constant 0 : index
    %c0_16 = arith.constant 0 : index
    %20 = vector.load %arg7[%c0_15, %c0_16] : memref<1x128xf32, #tpu.memory_space<vmem>>, vector<1x128xf32>
    %21 = vector.broadcast %20 : vector<1x128xf32> to vector<2x128xf32>
    %22 = arith.addf %19, %21 : vector<2x128xf32>
    %23 = arith.truncf %22 : vector<2x128xf32> to vector<2x128xbf16>
    %c0_17 = arith.constant 0 : index
    %c0_18 = arith.constant 0 : index
    %24 = vector.load %arg8[%c0_17, %c0_18] : memref<2x128xbf16, #tpu.memory_space<vmem>>, vector<2x128xbf16>
    tpu.vector_store %arg8[%c0_17, %c0_18], %23 {strides = array<i32>} : memref<2x128xbf16, #tpu.memory_space<vmem>>, vector<2x128xbf16>,
    return
  }
  func.func @transform_0(%arg0: i32) -> (i32, i32) {
    %c0_i32 = arith.constant 0 : i32
    %c0_i32_0 = arith.constant 0 : i32
    return %arg0, %c0_i32 : i32, i32
  }
  func.func @transform_1(%arg0: i32) -> (i32, i32) {
    %c0_i32 = arith.constant 0 : i32
    %c0_i32_0 = arith.constant 0 : i32
    %c0_i32_1 = arith.constant 0 : i32
    return %c0_i32, %c0_i32_0 : i32, i32
  }
  func.func @transform_2(%arg0: i32) -> (i32, i32) {
    %c0_i32 = arith.constant 0 : i32
    %c0_i32_0 = arith.constant 0 : i32
    %c0_i32_1 = arith.constant 0 : i32
    return %c0_i32, %c0_i32_0 : i32, i32
  }
  func.func @transform_3(%arg0: i32) -> (i32, i32) {
    %c0_i32 = arith.constant 0 : i32
    %c0_i32_0 = arith.constant 0 : i32
    %c0_i32_1 = arith.constant 0 : i32
    return %c0_i32, %c0_i32_0 : i32, i32
  }
  func.func @transform_4(%arg0: i32) -> (i32, i32) {
    %c0_i32 = arith.constant 0 : i32
    %c0_i32_0 = arith.constant 0 : i32
    %c0_i32_1 = arith.constant 0 : i32
    return %c0_i32, %c0_i32_0 : i32, i32
  }
  func.func @transform_5(%arg0: i32) -> (i32, i32) {
    %c0_i32 = arith.constant 0 : i32
    %c0_i32_0 = arith.constant 0 : i32
    %c0_i32_1 = arith.constant 0 : i32
    return %c0_i32, %c0_i32_0 : i32, i32
  }
  func.func @transform_6(%arg0: i32) -> (i32, i32) {
    %c0_i32 = arith.constant 0 : i32
    %c0_i32_0 = arith.constant 0 : i32
    %c0_i32_1 = arith.constant 0 : i32
    return %c0_i32, %c0_i32_0 : i32, i32
  }
  func.func @transform_7(%arg0: i32) -> (i32, i32) {
    %c0_i32 = arith.constant 0 : i32
    %c0_i32_0 = arith.constant 0 : i32
    return %arg0, %c0_i32 : i32, i32
  }
}

</mosaic_0001>

<bundles_post_ra>
// kernel: network_forward.1
= control target key start
LH: loop header
LB: loop body
LE: loop exit
PB: predicated region body
PF: predicated region fallthrough
CT: control target
= control target key end

     0   :  { %12 = vsyncpa [#allocation3], 0  ;;  %s595_s0 = inlined_call_operand.hbm [shape: f32[2,5], index: 0, kind: input, shape index: {}]   ;;  %s596_s1 = inlined_call_operand.hbm [shape: bf16[5,128], index: 1, kind: input, shape index: {}]   ;;  %s597_s2 = inlined_call_operand.hbm [shape: f32[1,128], index: 2, kind: input, shape index: {}]   ;;  %s598_s3 = inlined_call_operand.hbm [shape: bf16[128,128], index: 3, kind: input, shape index: {}]   ;;  %s599_s4 = inlined_call_operand.vmem [shape: f32[1,128], index: 4, kind: input, shape index: {}]   ;;  %s600_s5 = inlined_call_operand.hbm [shape: bf16[128,128], index: 5, kind: input, shape index: {}]   ;;  %s601_s6 = inlined_call_operand.vmem [shape: f32[1,128], index: 6, kind: input, shape index: {}]   ;;  %s602_s7 = inlined_call_operand.vmem [shape: bf16[2,128], index: 7, kind: output, shape index: {}]  }
   0x1   :  { %13 = vsyncpa [#allocation5], 0  ;;  %s31_s26 = sshll.u32 %s596_s1, 4  ;;  %s32_s26 = int_to_ptr.hbm [resolvable:$true] %s31_s26 }
   0x2   :  { %14 = vsyncpa [#allocation8], 0  ;;  %s523_s27 = smov [#allocation4]   ;;  %s52_s8 = sshll.u32 %s598_s3, 4  ;;  %s53_s8 = int_to_ptr.hbm [resolvable:$true] %s52_s8 }
   0x3   :  { %s33_s28 = sshll.u32 %s523_s27, 4  ;;  %s524_s9 = smov [#allocation7]   ;;  %s34_s28 = int_to_ptr.vmem [resolvable:$true] %s33_s28 }
   0x4   :  { %36 = dma.hbm_to_vmem [thread:$0]  %s32_s26, 64, %s34_s28, [#allocation5]  }
   0x5   :  { %s54_s10 = sshll.u32 %s524_s9, 4  ;;  %s525_s11 = smov 64   ;;  %s55_s10 = int_to_ptr.vmem [resolvable:$true] %s54_s10 }
   0x6   :  { %s526_s12 = smov 4   ;;  %s20_s1 = sshll.u32 %s595_s0, 4  ;;  %s21_s1 = int_to_ptr.hbm [resolvable:$true] %s20_s1 }
   0x7   :  { %60 = dma.hbm_to_vmem [thread:$0]  %s53_s8, 1024, %s55_s10, [#allocation8], %s525_s11, %s525_s11, %s526_s12  }
   0x8   :  { %s527_s15 = smov [#allocation2]   ;;  %s42_s3 = sshll.u32 %s597_s2, 4  ;;  %s43_s3 = int_to_ptr.hbm [resolvable:$true] %s42_s3 }
   0x9   :  { %s22_s16 = sshll.u32 %s527_s15, 4  ;;  %s528_s19 = smov [#allocation6]   ;;  %s23_s16 = int_to_ptr.vmem [resolvable:$true] %s22_s16 }
   0xa   :  { %25 = dma.hbm_to_vmem [thread:$0]  %s21_s1, 32, %s23_s16, [#allocation3]  }
   0xb   :  { %s44_s20 = sshll.u32 %s528_s19, 4  ;;  %s67_s23 = sshll.u32 %s600_s5, 4  ;;  %s45_s20 = int_to_ptr.vmem [resolvable:$true] %s44_s20  ;;  %s68_s23 = int_to_ptr.hbm [resolvable:$true] %s67_s23 }
   0xc   :  { %47 = dma.hbm_to_vmem [thread:$0]  %s43_s3, 16, %s45_s20, [#allocation5]  }
   0xd   :  { %s529_s0 = smov [#allocation9]  }
   0xe   :  { %s69_s24 = sshll.u32 %s529_s0, 4  ;;  %s70_s24 = int_to_ptr.vmem [resolvable:$true] %s69_s24 }
   0xf   :  { %75 = dma.hbm_to_vmem [thread:$0]  %s68_s23, 1024, %s70_s24, [#allocation8], %s525_s11, %s525_s11, %s526_s12  }
  0x10   :  { %517 = dma.done.wait [#allocation3], 32  }
  0x11   :  { %518 = vsyncadd [#allocation3], 4294967264 }
  0x12   :  { %519 = dma.done.wait [#allocation5], 80  }
  0x13   :  { %520 = vsyncadd [#allocation5], 4294967216 }
  0x14   :  { %521 = dma.done.wait [#allocation8], 2048  }
  0x15   :  { %522 = vsyncadd [#allocation8], 4294965248  ;;  %vm110_vm0 = vcmask 1041408   ;;  %vm111_vm1 = vcmask 1042432   ;;  %v530_v0 = vmov 65535   ;;  %v377_v5 = vld [vmem:[#allocation7 + $0x38] sm:$0xff] }
  0x16   :  { %v112_v1 = vsel %vm110_vm0, 4294967295, %v530_v0  ;;  %v101_v3 = vld [vmem:[#allocation4] sm:$0x7]  ;;  %v99_v4 = vld [vmem:[#allocation2] sm:$0x3]  ;;  %200 = vmatpush.bf16.msra.mxu1 %v377_v5  ;;  %v376_v8 = vld [vmem:[#allocation7 + $0x30] sm:$0xff] }
  0x17   :  { %v113_v2 = vsel %vm111_vm1, %v112_v1, 0  ;;  %v100_v7 = vpack.c.bf16 %v99_v4, %v99_v4  ;;  %vm106_vm2 = vcmask 39936   ;;  %v375_v9 = vld [vmem:[#allocation7 + $0x28] sm:$0xff]  ;;  %v374_v10 = vld [vmem:[#allocation7 + $0x20] sm:$0xff]  ;;  %v373_v11 = vld [vmem:[#allocation7 + $0x18] sm:$0xff] }
  0x18   :  { %v115_v6 = vand.u32 %v113_v2, %v101_v3  ;;  %v372_v12 = vld [vmem:[#allocation7 + $0x10] sm:$0xff]  ;;  %v371_v13 = vld [vmem:[#allocation7 + $0x8] sm:$0xff]  ;;  %v370_v14 = vld [vmem:[#allocation7] sm:$0xff] }
  0x19   :  { %v385_v15 = vld [vmem:[#allocation9 + $0x38] sm:$0xff]  ;;  %v384_v16 = vld [vmem:[#allocation9 + $0x30] sm:$0xff]  ;;  %v383_v17 = vld [vmem:[#allocation9 + $0x28] sm:$0xff] }
  0x1a   :  { %124 = vmatpush.bf16.msra.mxu0 %v115_v6  ;;  %201 = vmatpush.bf16.msra.mxu1 %v376_v8  ;;  %v382_v18 = vld [vmem:[#allocation9 + $0x20] sm:$0xff]  ;;  %v381_v19 = vld [vmem:[#allocation9 + $0x18] sm:$0xff]  ;;  %v380_v20 = vld [vmem:[#allocation9 + $0x10] sm:$0xff] }
  0x1b   :  { %283 = vmatpush.bf16.msra.mxu2 %v385_v15  ;;  %v394_v21 = vld [vmem:[#allocation6] ss:$0 sm:$0xff]  ;;  %v379_v27 = vld [vmem:[#allocation9 + $0x8] sm:$0xff]  ;;  %v378_v28 = vld [vmem:[#allocation9] sm:$0xff] }
  0x1c   :  { %v395_v29 = vld [vmem:[%s599_s4] ss:$0 sm:$0xff] }
  0x1d   :  { %305 = vmatmul.msk.bf16.vlgmr.msra.gmra.mxu0 %vm106_vm2, %v100_v7  ;;  %v396_v35 = vld [vmem:[%s601_s6] ss:$0 sm:$0xff] }
  0x1e   :  { %202 = vmatpush.bf16.msra.mxu1 %v375_v9 }
  0x1f   :  { %284 = vmatpush.bf16.msra.mxu2 %v384_v16 }
  0x22   :  { %203 = vmatpush.bf16.msra.mxu1 %v374_v10 }
  0x23   :  { %285 = vmatpush.bf16.msra.mxu2 %v383_v17 }
  0x26   :  { %204 = vmatpush.bf16.msra.mxu1 %v373_v11 }
  0x27   :  { %286 = vmatpush.bf16.msra.mxu2 %v382_v18 }
  0x2a   :  { %205 = vmatpush.bf16.msra.mxu1 %v372_v12 }
  0x2b   :  { %287 = vmatpush.bf16.msra.mxu2 %v381_v19 }
  0x2e   :  { %206 = vmatpush.bf16.msra.mxu1 %v371_v13 }
  0x2f   :  { %288 = vmatpush.bf16.msra.mxu2 %v380_v20 }
  0x32   :  { %207 = vmatpush.bf16.msra.mxu1 %v370_v14 }
  0x33   :  { %289 = vmatpush.bf16.msra.mxu2 %v379_v27 }
  0x37   :  { %290 = vmatpush.bf16.msra.mxu2 %v378_v28 }
  0x9a   :  { %v126_v22 = vpop.f32.mrf.mxu0 }
  0x9b   :  { %v127_v23 = vadd.f32 %v394_v21, %v126_v22 }
  0x9d   :  { %v130_v24 = vmax.f32 %v127_v23, 0.0 }
  0x9f   :  { %v131_v25 = vpack.c.bf16 %v130_v24, %v130_v24 }
  0xa1   :  { %208 = vmatmul.bf16.vlgmr.msra.gmra.mxu1 %v131_v25 }
  0xa2   :  { %v128_v26 = vpop.f32.mrf.mxu0 }
 0x11e   :  { %v209_v30 = vpop.f32.mrf.mxu1 }
 0x11f   :  { %v210_v31 = vadd.f32 %v395_v29, %v209_v30 }
 0x121   :  { %v213_v32 = vmax.f32 %v210_v31, 0.0 }
 0x123   :  { %v214_v33 = vpack.c.bf16 %v213_v32, %v213_v32 }
 0x125   :  { %291 = vmatmul.bf16.vlgmr.msra.gmra.mxu2 %v214_v33 }
 0x126   :  { %v211_v34 = vpop.f32.mrf.mxu1 }
 0x1a8   :  { %v292_v36 = vpop.f32.mrf.mxu2 }
 0x1a9   :  { %v293_v37 = vadd.f32 %v396_v35, %v292_v36 }
 0x1ab   :  { %v296_v38 = vpack.c.bf16 %v293_v37, %v293_v37 }
 0x1ad   :  { %297 = vst [vmem:[%s602_s7] sm:$0x1] %v296_v38 }
 0x1b0   :  { %v294_v39 = vpop.f32.mrf.mxu2 }
 0x1b1   :  { %302 = vsyncpa [#allocation3], 1 }
 0x1b2   :  { %303 = vsyncpa [#allocation5], 1 }
 0x1b3   :  { %304 = vsyncpa [#allocation8], 1 }

</bundles_post_ra>
